<compile_context>
chip_gen: v5e
topology: v5e:2x2
jax: 0.10.0
libtpu: 0.0.40
codegen_flags: <defaults>
</compile_context>

<pallas_src>
import functools
from typing import List

import jax
import jax.numpy as jnp
from jax.experimental import pallas as pl
from jax.experimental.pallas import tpu as pltpu

_LANE = 128      # last dim of every block padded to a multiple of this
_SUBLANE = 8     # second-to-last dim padded to a multiple of this


def _round_up(x: int, m: int) -> int:
    return ((x + m - 1) // m) * m


def _mlp_fused_kernel(*refs, num_layers: int):
    """Fused MLP forward: all layers in a single kernel invocation.

    refs = (x_ref, w0, b0, ..., w_{L-1}, b_{L-1}, o_ref)
    x_ref: [TB, D0p] f32   w_l: [D(l)p, D(l+1)p] bf16   b_l: [1, D(l+1)p] f32
    o_ref: [TB, DLp] f32.  Intermediates stay on-chip (vregs/VMEM).
    """
    x_ref = refs[0]
    o_ref = refs[-1]
    wb_refs = refs[1:-1]

    h = x_ref[...]                               # f32 activations
    for layer in range(num_layers):
        w_ref = wb_refs[2 * layer]
        b_ref = wb_refs[2 * layer + 1]
        # bf16 operands on the MXU, f32 accumulation.
        h = jnp.dot(h.astype(w_ref.dtype), w_ref[...],
                    preferred_element_type=jnp.float32)
        h = h + b_ref[...]                       # broadcast [1, Dout] -> [TB, Dout]
        if layer < num_layers - 1:
            h = jnp.maximum(h, 0.0)              # ReLU on all but the last layer
    o_ref[...] = h.astype(o_ref.dtype)


def pallas_mlp_forward(x: jax.Array, weights_p, biases_p, out_dim: int) -> jax.Array:
    """Runs the fused MLP kernel.

    x:         [B, D0] (unpadded)
    weights_p: lane-padded bf16 weights, weights_p[l]: [D(l)p, D(l+1)p]
    biases_p:  lane-padded f32 biases,   biases_p[l]:  [1, D(l+1)p]
    out_dim:   true output feature dim; result sliced to [B, out_dim]
    """
    num_layers = len(weights_p)
    batch, d0 = x.shape
    d0p = weights_p[0].shape[0]
    dlp = weights_p[-1].shape[1]

    # Batch tiling: up to 256 rows per tile (fills the 2x256x256 MXU on
    # v6e/v7x and amortizes ~0.35 us per-grid-step overhead).  Small batches
    # use one full-batch block.
    bp8 = _round_up(batch, _SUBLANE)
    tb = min(bp8, 256)
    bp = _round_up(batch, tb)

    # Zero-pad activations (padded lanes remain exactly 0 through every layer).
    xp = jnp.zeros((bp, d0p), jnp.float32).at[:batch, :d0].set(
        x.astype(jnp.float32))

    args = [xp]
    for w, b in zip(weights_p, biases_p):
        args.append(w)
        args.append(b)

    # --- VMEM budget (explicit, instead of the 16/32 MiB default scope). ---
    param_bytes = sum(int(a.size) * a.dtype.itemsize for a in args[1:])
    widest = max([d0p, dlp] + [int(w.shape[1]) for w in weights_p])
    act_bytes = (2 * tb * d0p + 2 * tb * dlp + 2 * tb * widest) * 4
    needed = 2 * param_bytes + act_bytes          # worst case: params 2x-buffered
    try:
        phys_vmem = int(pltpu.get_tpu_info().vmem_capacity_bytes)
    except Exception:
        phys_vmem = 64 << 20                      # conservative (v7x per-TC)
    vmem_cap = min(100 << 20, int(phys_vmem * 0.85))
    vmem_limit = min(vmem_cap, max(32 << 20, int(needed * 1.25) + (8 << 20)))

    # Advisory cost estimate for XLA's scheduler around the custom call.
    flops = 2 * bp * sum(int(w.shape[0]) * int(w.shape[1]) for w in weights_p)
    bytes_accessed = param_bytes + (bp * d0p + bp * dlp) * 4
    cost = pl.CostEstimate(flops=flops, transcendentals=0,
                           bytes_accessed=bytes_accessed)

    kernel = functools.partial(_mlp_fused_kernel, num_layers=num_layers)
    out_shape = jax.ShapeDtypeStruct((bp, dlp), jnp.float32)
    x_spec = pl.BlockSpec((tb, d0p), lambda i: (i, 0))
    # Lane-dense (>=128-wide) padded output block; do NOT shrink below 128
    # lanes (would fall back to masked vst.msk partial stores).
    out_spec = pl.BlockSpec((tb, dlp), lambda i: (i, 0))

    def build(single_buffer_params: bool):
        in_specs = [x_spec]
        for w, b in zip(weights_p, biases_p):
            # Constant index_map across the batch axis: params are fetched into
            # VMEM once and stay resident; single-buffer them (no point in a
            # second buffer for data that never changes).
            if single_buffer_params:
                in_specs.append(pl.BlockSpec(w.shape, lambda i: (0, 0),
                                             pipeline_mode=pl.Buffered(1)))
                in_specs.append(pl.BlockSpec(b.shape, lambda i: (0, 0),
                                             pipeline_mode=pl.Buffered(1)))
            else:
                in_specs.append(pl.BlockSpec(w.shape, lambda i: (0, 0)))
                in_specs.append(pl.BlockSpec(b.shape, lambda i: (0, 0)))
        return pl.pallas_call(
            kernel,
            out_shape=out_shape,
            grid=(bp // tb,),
            in_specs=in_specs,
            out_specs=out_spec,
            compiler_params=pltpu.CompilerParams(
                dimension_semantics=("parallel",),
                vmem_limit_bytes=vmem_limit),
            cost_estimate=cost,
        )

    try:
        out_p = build(True)(*args)
    except Exception:
        # Fallback: default double-buffered params (costs VMEM, still correct).
        out_p = build(False)(*args)

    return out_p[:batch, :out_dim]


class MultiLayerPerceptronPallas:
    """Pallas re-implementation of the PyTorch MultiLayerPerceptron.

    forward: Linear + activation for all layers except the last, then Linear.
    Activation fixed to ReLU (a typical `torch.nn.ReLU()` choice).
    """

    def __init__(self, hidden_dimensions: List[int], key: jax.Array):
        self.dims = list(hidden_dimensions)
        self.weights = []          # f32 master weights [din, dout]
        self.biases = []           # f32 biases [1, dout]
        for i in range(len(hidden_dimensions) - 1):
            din, dout = hidden_dimensions[i], hidden_dimensions[i + 1]
            key, kw, kb = jax.random.split(key, 3)
            # Mimics torch.nn.Linear's uniform(-1/sqrt(din), 1/sqrt(din)).
            bound = 1.0 / (din ** 0.5)
            w = jax.random.uniform(kw, (din, dout), jnp.float32, -bound, bound)
            b = jax.random.uniform(kb, (1, dout), jnp.float32, -bound, bound)
            self.weights.append(w)
            self.biases.append(b)

        # Pre-pad ONCE (feature dims -> multiples of 128 lanes); weights cast
        # to bf16 (operands only — accumulation in-kernel stays f32).
        self.weights_p = []
        self.biases_p = []
        for w, b in zip(self.weights, self.biases):
            din, dout = w.shape
            dinp, doutp = _round_up(din, _LANE), _round_up(dout, _LANE)
            wp = jnp.zeros((dinp, doutp), jnp.bfloat16).at[:din, :dout].set(
                w.astype(jnp.bfloat16))
            bp = jnp.zeros((1, doutp), jnp.float32).at[:, :dout].set(b)
            self.weights_p.append(wp)
            self.biases_p.append(bp)

    def __call__(self, x: jax.Array) -> jax.Array:
        return pallas_mlp_forward(x, self.weights_p, self.biases_p, self.dims[-1])

    def reference(self, x: jax.Array) -> jax.Array:
        """Pure-JAX reference with the SAME bf16 operand rounding (tight check)."""
        h = x
        n = len(self.weights)
        for i in range(n):
            w_b = self.weights[i].astype(jnp.bfloat16)
            h = jnp.dot(h.astype(jnp.bfloat16), w_b,
                        preferred_element_type=jnp.float32) + self.biases[i]
            if i < n - 1:
                h = jnp.maximum(h, 0.0)
        return h

    def reference_f32(self, x: jax.Array) -> jax.Array:
        """Full-precision reference (loose sanity check of MLP semantics)."""
        h = x
        n = len(self.weights)
        for i in range(n - 1):
            h = jnp.maximum(h @ self.weights[i] + self.biases[i], 0.0)
        return h @ self.weights[-1] + self.biases[-1]


if __name__ == "__main__":
    key = jax.random.PRNGKey(0)
    key, kx, kp = jax.random.split(key, 3)

    # hidden_dimensions: [input_dim, hidden..., n_classes]
    hidden_dimensions = [32, 64, 64, 16]
    batch = 8

    model = MultiLayerPerceptronPallas(hidden_dimensions, kp)
    x = jax.random.normal(kx, (batch, hidden_dimensions[0]), jnp.float32)

    out = model(x)
    out = jax.block_until_ready(out)
    assert out.shape == (batch, hidden_dimensions[-1])

    # Tight check vs a bf16-operand / f32-accumulate reference.
    ref = model.reference(x)
    assert jnp.allclose(out, ref, atol=1e-3, rtol=1e-3), "mismatch vs bf16 reference"

    # Loose sanity check vs the full f32 reference (bf16 operand rounding only).
    ref32 = model.reference_f32(x)
    assert jnp.allclose(out, ref32, atol=5e-2, rtol=5e-2), "mismatch vs f32 reference"

    print("KERNEL_OK")
</pallas_src>

<mosaic_0001>
module attributes {stable_mosaic.version = 11 : i64} {
  func.func @_mlp_fused_kernel(%arg0: i32, %arg1: memref<8x128xf32, #tpu.memory_space<vmem>>, %arg2: memref<128x128xbf16, #tpu.memory_space<vmem>>, %arg3: memref<1x128xf32, #tpu.memory_space<vmem>>, %arg4: memref<128x128xbf16, #tpu.memory_space<vmem>>, %arg5: memref<1x128xf32, #tpu.memory_space<vmem>>, %arg6: memref<128x128xbf16, #tpu.memory_space<vmem>>, %arg7: memref<1x128xf32, #tpu.memory_space<vmem>>, %arg8: memref<8x128xf32, #tpu.memory_space<vmem>>) attributes {dimension_semantics = [#tpu.dimension_semantics<parallel>], iteration_bounds = array<i64: 1>, scalar_prefetch = 0 : i64, scratch_operands = 0 : i64, tpu.core_type = #tpu.core_type<tc>, window_params = [{transform_indices = @transform_0, window_bounds = array<i64: 8, 128>}, {pipeline_mode = #tpu.pipeline_mode<synchronous>, transform_indices = @transform_1, window_bounds = array<i64: 128, 128>}, {pipeline_mode = #tpu.pipeline_mode<synchronous>, transform_indices = @transform_2, window_bounds = array<i64: 1, 128>}, {pipeline_mode = #tpu.pipeline_mode<synchronous>, transform_indices = @transform_3, window_bounds = array<i64: 128, 128>}, {pipeline_mode = #tpu.pipeline_mode<synchronous>, transform_indices = @transform_4, window_bounds = array<i64: 1, 128>}, {pipeline_mode = #tpu.pipeline_mode<synchronous>, transform_indices = @transform_5, window_bounds = array<i64: 128, 128>}, {pipeline_mode = #tpu.pipeline_mode<synchronous>, transform_indices = @transform_6, window_bounds = array<i64: 1, 128>}, {transform_indices = @transform_7, window_bounds = array<i64: 8, 128>}]} {
    %c0 = arith.constant 0 : index
    %c0_0 = arith.constant 0 : index
    %0 = vector.load %arg1[%c0, %c0_0] : memref<8x128xf32, #tpu.memory_space<vmem>>, vector<8x128xf32>
    %1 = arith.truncf %0 : vector<8x128xf32> to vector<8x128xbf16>
    %c0_1 = arith.constant 0 : index
    %c0_2 = arith.constant 0 : index
    %2 = vector.load %arg2[%c0_1, %c0_2] : memref<128x128xbf16, #tpu.memory_space<vmem>>, vector<128x128xbf16>
    %cst = arith.constant dense<0.000000e+00> : vector<8x128xf32>
    %3 = tpu.matmul %1, %2, %cst {dimension_numbers = #tpu.dot_dimension_numbers<[1], [0], [0], [1], [0, 0, 1, 1], [], []>} : vector<8x128xbf16>, vector<128x128xbf16>, vector<8x128xf32> -> vector<8x128xf32>
    %c0_3 = arith.constant 0 : index
    %c0_4 = arith.constant 0 : index
    %4 = vector.load %arg3[%c0_3, %c0_4] : memref<1x128xf32, #tpu.memory_space<vmem>>, vector<1x128xf32>
    %5 = vector.broadcast %4 : vector<1x128xf32> to vector<8x128xf32>
    %6 = arith.addf %3, %5 : vector<8x128xf32>
    %cst_5 = arith.constant 0.000000e+00 : f32
    %7 = vector.broadcast %cst_5 : f32 to vector<8x128xf32>
    %8 = arith.maximumf %6, %7 : vector<8x128xf32>
    %9 = arith.truncf %8 : vector<8x128xf32> to vector<8x128xbf16>
    %c0_6 = arith.constant 0 : index
    %c0_7 = arith.constant 0 : index
    %10 = vector.load %arg4[%c0_6, %c0_7] : memref<128x128xbf16, #tpu.memory_space<vmem>>, vector<128x128xbf16>
    %cst_8 = arith.constant dense<0.000000e+00> : vector<8x128xf32>
    %11 = tpu.matmul %9, %10, %cst_8 {dimension_numbers = #tpu.dot_dimension_numbers<[1], [0], [0], [1], [0, 0, 1, 1], [], []>} : vector<8x128xbf16>, vector<128x128xbf16>, vector<8x128xf32> -> vector<8x128xf32>
    %c0_9 = arith.constant 0 : index
    %c0_10 = arith.constant 0 : index
    %12 = vector.load %arg5[%c0_9, %c0_10] : memref<1x128xf32, #tpu.memory_space<vmem>>, vector<1x128xf32>
    %13 = vector.broadcast %12 : vector<1x128xf32> to vector<8x128xf32>
    %14 = arith.addf %11, %13 : vector<8x128xf32>
    %cst_11 = arith.constant 0.000000e+00 : f32
    %15 = vector.broadcast %cst_11 : f32 to vector<8x128xf32>
    %16 = arith.maximumf %14, %15 : vector<8x128xf32>
    %17 = arith.truncf %16 : vector<8x128xf32> to vector<8x128xbf16>
    %c0_12 = arith.constant 0 : index
    %c0_13 = arith.constant 0 : index
    %18 = vector.load %arg6[%c0_12, %c0_13] : memref<128x128xbf16, #tpu.memory_space<vmem>>, vector<128x128xbf16>
    %cst_14 = arith.constant dense<0.000000e+00> : vector<8x128xf32>
    %19 = tpu.matmul %17, %18, %cst_14 {dimension_numbers = #tpu.dot_dimension_numbers<[1], [0], [0], [1], [0, 0, 1, 1], [], []>} : vector<8x128xbf16>, vector<128x128xbf16>, vector<8x128xf32> -> vector<8x128xf32>
    %c0_15 = arith.constant 0 : index
    %c0_16 = arith.constant 0 : index
    %20 = vector.load %arg7[%c0_15, %c0_16] : memref<1x128xf32, #tpu.memory_space<vmem>>, vector<1x128xf32>
    %21 = vector.broadcast %20 : vector<1x128xf32> to vector<8x128xf32>
    %22 = arith.addf %19, %21 : vector<8x128xf32>
    %c0_17 = arith.constant 0 : index
    %c0_18 = arith.constant 0 : index
    %23 = vector.load %arg8[%c0_17, %c0_18] : memref<8x128xf32, #tpu.memory_space<vmem>>, vector<8x128xf32>
    tpu.vector_store %arg8[%c0_17, %c0_18], %22 {strides = array<i32>} : memref<8x128xf32, #tpu.memory_space<vmem>>, vector<8x128xf32>,
    return
  }
  func.func @transform_0(%arg0: i32) -> (i32, i32) {
    %c0_i32 = arith.constant 0 : i32
    %c0_i32_0 = arith.constant 0 : i32
    return %arg0, %c0_i32 : i32, i32
  }
  func.func @transform_1(%arg0: i32) -> (i32, i32) {
    %c0_i32 = arith.constant 0 : i32
    %c0_i32_0 = arith.constant 0 : i32
    %c0_i32_1 = arith.constant 0 : i32
    return %c0_i32, %c0_i32_0 : i32, i32
  }
  func.func @transform_2(%arg0: i32) -> (i32, i32) {
    %c0_i32 = arith.constant 0 : i32
    %c0_i32_0 = arith.constant 0 : i32
    %c0_i32_1 = arith.constant 0 : i32
    return %c0_i32, %c0_i32_0 : i32, i32
  }
  func.func @transform_3(%arg0: i32) -> (i32, i32) {
    %c0_i32 = arith.constant 0 : i32
    %c0_i32_0 = arith.constant 0 : i32
    %c0_i32_1 = arith.constant 0 : i32
    return %c0_i32, %c0_i32_0 : i32, i32
  }
  func.func @transform_4(%arg0: i32) -> (i32, i32) {
    %c0_i32 = arith.constant 0 : i32
    %c0_i32_0 = arith.constant 0 : i32
    %c0_i32_1 = arith.constant 0 : i32
    return %c0_i32, %c0_i32_0 : i32, i32
  }
  func.func @transform_5(%arg0: i32) -> (i32, i32) {
    %c0_i32 = arith.constant 0 : i32
    %c0_i32_0 = arith.constant 0 : i32
    %c0_i32_1 = arith.constant 0 : i32
    return %c0_i32, %c0_i32_0 : i32, i32
  }
  func.func @transform_6(%arg0: i32) -> (i32, i32) {
    %c0_i32 = arith.constant 0 : i32
    %c0_i32_0 = arith.constant 0 : i32
    %c0_i32_1 = arith.constant 0 : i32
    return %c0_i32, %c0_i32_0 : i32, i32
  }
  func.func @transform_7(%arg0: i32) -> (i32, i32) {
    %c0_i32 = arith.constant 0 : i32
    %c0_i32_0 = arith.constant 0 : i32
    return %arg0, %c0_i32 : i32, i32
  }
}

module attributes {stable_mosaic.version = 11 : i64} {
  func.func @_mlp_fused_kernel(%arg0: i32, %arg1: memref<8x128xf32, #tpu.memory_space<vmem>>, %arg2: memref<128x128xbf16, #tpu.memory_space<vmem>>, %arg3: memref<1x128xf32, #tpu.memory_space<vmem>>, %arg4: memref<128x128xbf16, #tpu.memory_space<vmem>>, %arg5: memref<1x128xf32, #tpu.memory_space<vmem>>, %arg6: memref<128x128xbf16, #tpu.memory_space<vmem>>, %arg7: memref<1x128xf32, #tpu.memory_space<vmem>>, %arg8: memref<8x128xf32, #tpu.memory_space<vmem>>) attributes {dimension_semantics = [#tpu.dimension_semantics<parallel>], iteration_bounds = array<i64: 1>, scalar_prefetch = 0 : i64, scratch_operands = 0 : i64, tpu.core_type = #tpu.core_type<tc>, window_params = [{transform_indices = @transform_0, window_bounds = array<i64: 8, 128>}, {pipeline_mode = #tpu.pipeline_mode<synchronous>, transform_indices = @transform_1, window_bounds = array<i64: 128, 128>}, {pipeline_mode = #tpu.pipeline_mode<synchronous>, transform_indices = @transform_2, window_bounds = array<i64: 1, 128>}, {pipeline_mode = #tpu.pipeline_mode<synchronous>, transform_indices = @transform_3, window_bounds = array<i64: 128, 128>}, {pipeline_mode = #tpu.pipeline_mode<synchronous>, transform_indices = @transform_4, window_bounds = array<i64: 1, 128>}, {pipeline_mode = #tpu.pipeline_mode<synchronous>, transform_indices = @transform_5, window_bounds = array<i64: 128, 128>}, {pipeline_mode = #tpu.pipeline_mode<synchronous>, transform_indices = @transform_6, window_bounds = array<i64: 1, 128>}, {transform_indices = @transform_7, window_bounds = array<i64: 8, 128>}]} {
    %c0 = arith.constant 0 : index
    %c0_0 = arith.constant 0 : index
    %0 = vector.load %arg1[%c0, %c0_0] : memref<8x128xf32, #tpu.memory_space<vmem>>, vector<8x128xf32>
    %1 = arith.truncf %0 : vector<8x128xf32> to vector<8x128xbf16>
    %c0_1 = arith.constant 0 : index
    %c0_2 = arith.constant 0 : index
    %2 = vector.load %arg2[%c0_1, %c0_2] : memref<128x128xbf16, #tpu.memory_space<vmem>>, vector<128x128xbf16>
    %cst = arith.constant dense<0.000000e+00> : vector<8x128xf32>
    %3 = tpu.matmul %1, %2, %cst {dimension_numbers = #tpu.dot_dimension_numbers<[1], [0], [0], [1], [0, 0, 1, 1], [], []>} : vector<8x128xbf16>, vector<128x128xbf16>, vector<8x128xf32> -> vector<8x128xf32>
    %c0_3 = arith.constant 0 : index
    %c0_4 = arith.constant 0 : index
    %4 = vector.load %arg3[%c0_3, %c0_4] : memref<1x128xf32, #tpu.memory_space<vmem>>, vector<1x128xf32>
    %5 = vector.broadcast %4 : vector<1x128xf32> to vector<8x128xf32>
    %6 = arith.addf %3, %5 : vector<8x128xf32>
    %cst_5 = arith.constant 0.000000e+00 : f32
    %7 = vector.broadcast %cst_5 : f32 to vector<8x128xf32>
    %8 = arith.maximumf %6, %7 : vector<8x128xf32>
    %9 = arith.truncf %8 : vector<8x128xf32> to vector<8x128xbf16>
    %c0_6 = arith.constant 0 : index
    %c0_7 = arith.constant 0 : index
    %10 = vector.load %arg4[%c0_6, %c0_7] : memref<128x128xbf16, #tpu.memory_space<vmem>>, vector<128x128xbf16>
    %cst_8 = arith.constant dense<0.000000e+00> : vector<8x128xf32>
    %11 = tpu.matmul %9, %10, %cst_8 {dimension_numbers = #tpu.dot_dimension_numbers<[1], [0], [0], [1], [0, 0, 1, 1], [], []>} : vector<8x128xbf16>, vector<128x128xbf16>, vector<8x128xf32> -> vector<8x128xf32>
    %c0_9 = arith.constant 0 : index
    %c0_10 = arith.constant 0 : index
    %12 = vector.load %arg5[%c0_9, %c0_10] : memref<1x128xf32, #tpu.memory_space<vmem>>, vector<1x128xf32>
    %13 = vector.broadcast %12 : vector<1x128xf32> to vector<8x128xf32>
    %14 = arith.addf %11, %13 : vector<8x128xf32>
    %cst_11 = arith.constant 0.000000e+00 : f32
    %15 = vector.broadcast %cst_11 : f32 to vector<8x128xf32>
    %16 = arith.maximumf %14, %15 : vector<8x128xf32>
    %17 = arith.truncf %16 : vector<8x128xf32> to vector<8x128xbf16>
    %c0_12 = arith.constant 0 : index
    %c0_13 = arith.constant 0 : index
    %18 = vector.load %arg6[%c0_12, %c0_13] : memref<128x128xbf16, #tpu.memory_space<vmem>>, vector<128x128xbf16>
    %cst_14 = arith.constant dense<0.000000e+00> : vector<8x128xf32>
    %19 = tpu.matmul %17, %18, %cst_14 {dimension_numbers = #tpu.dot_dimension_numbers<[1], [0], [0], [1], [0, 0, 1, 1], [], []>} : vector<8x128xbf16>, vector<128x128xbf16>, vector<8x128xf32> -> vector<8x128xf32>
    %c0_15 = arith.constant 0 : index
    %c0_16 = arith.constant 0 : index
    %20 = vector.load %arg7[%c0_15, %c0_16] : memref<1x128xf32, #tpu.memory_space<vmem>>, vector<1x128xf32>
    %21 = vector.broadcast %20 : vector<1x128xf32> to vector<8x128xf32>
    %22 = arith.addf %19, %21 : vector<8x128xf32>
    %c0_17 = arith.constant 0 : index
    %c0_18 = arith.constant 0 : index
    %23 = vector.load %arg8[%c0_17, %c0_18] : memref<8x128xf32, #tpu.memory_space<vmem>>, vector<8x128xf32>
    tpu.vector_store %arg8[%c0_17, %c0_18], %22 {strides = array<i32>} : memref<8x128xf32, #tpu.memory_space<vmem>>, vector<8x128xf32>,
    return
  }
  func.func @transform_0(%arg0: i32) -> (i32, i32) {
    %c0_i32 = arith.constant 0 : i32
    %c0_i32_0 = arith.constant 0 : i32
    return %arg0, %c0_i32 : i32, i32
  }
  func.func @transform_1(%arg0: i32) -> (i32, i32) {
    %c0_i32 = arith.constant 0 : i32
    %c0_i32_0 = arith.constant 0 : i32
    %c0_i32_1 = arith.constant 0 : i32
    return %c0_i32, %c0_i32_0 : i32, i32
  }
  func.func @transform_2(%arg0: i32) -> (i32, i32) {
    %c0_i32 = arith.constant 0 : i32
    %c0_i32_0 = arith.constant 0 : i32
    %c0_i32_1 = arith.constant 0 : i32
    return %c0_i32, %c0_i32_0 : i32, i32
  }
  func.func @transform_3(%arg0: i32) -> (i32, i32) {
    %c0_i32 = arith.constant 0 : i32
    %c0_i32_0 = arith.constant 0 : i32
    %c0_i32_1 = arith.constant 0 : i32
    return %c0_i32, %c0_i32_0 : i32, i32
  }
  func.func @transform_4(%arg0: i32) -> (i32, i32) {
    %c0_i32 = arith.constant 0 : i32
    %c0_i32_0 = arith.constant 0 : i32
    %c0_i32_1 = arith.constant 0 : i32
    return %c0_i32, %c0_i32_0 : i32, i32
  }
  func.func @transform_5(%arg0: i32) -> (i32, i32) {
    %c0_i32 = arith.constant 0 : i32
    %c0_i32_0 = arith.constant 0 : i32
    %c0_i32_1 = arith.constant 0 : i32
    return %c0_i32, %c0_i32_0 : i32, i32
  }
  func.func @transform_6(%arg0: i32) -> (i32, i32) {
    %c0_i32 = arith.constant 0 : i32
    %c0_i32_0 = arith.constant 0 : i32
    %c0_i32_1 = arith.constant 0 : i32
    return %c0_i32, %c0_i32_0 : i32, i32
  }
  func.func @transform_7(%arg0: i32) -> (i32, i32) {
    %c0_i32 = arith.constant 0 : i32
    %c0_i32_0 = arith.constant 0 : i32
    return %arg0, %c0_i32 : i32, i32
  }
}

</mosaic_0001>

<bundles_post_ra>
// kernel: tpu_custom_call.1
= control target key start
LH: loop header
LB: loop body
LE: loop exit
PB: predicated region body
PF: predicated region fallthrough
CT: control target
= control target key end

     0   :  { %12 = vsyncpa [#allocation3], 0  ;;  %s686_s0 = inlined_call_operand.hbm [shape: f32[8,128], index: 0, kind: input, shape index: {}]   ;;  %s687_s1 = inlined_call_operand.hbm [shape: bf16[128,128], index: 1, kind: input, shape index: {}]   ;;  %s688_s2 = inlined_call_operand.vmem [shape: f32[1,128], index: 2, kind: input, shape index: {}]   ;;  %s689_s3 = inlined_call_operand.hbm [shape: bf16[128,128], index: 3, kind: input, shape index: {}]   ;;  %s690_s4 = inlined_call_operand.vmem [shape: f32[1,128], index: 4, kind: input, shape index: {}]   ;;  %s691_s5 = inlined_call_operand.hbm [shape: bf16[128,128], index: 5, kind: input, shape index: {}]   ;;  %s692_s6 = inlined_call_operand.vmem [shape: f32[1,128], index: 6, kind: input, shape index: {}]   ;;  %s693_s7 = inlined_call_operand.hbm [shape: f32[8,128], index: 7, kind: output, shape index: {}]  }
   0x1   :  { %13 = vsyncpa [#allocation6], 0 }
   0x2   :  { %14 = vsyncpa [#allocation9], 0  ;;  %s31_s26 = sshll.u32 %s687_s1, 4  ;;  %s32_s26 = int_to_ptr.hbm [resolvable:$true] %s31_s26 }
   0x3   :  { %15 = vsyncpa [#allocation4], 0  ;;  %s615_s27 = smov [#allocation5]   ;;  %s21_s8 = sshll.u32 %s686_s0, 4  ;;  %s22_s8 = int_to_ptr.hbm [resolvable:$true] %s21_s8 }
   0x4   :  { %s33_s28 = sshll.u32 %s615_s27, 4  ;;  %s616_s9 = smov 64   ;;  %s34_s28 = int_to_ptr.vmem [resolvable:$true] %s33_s28 }
   0x5   :  { %s617_s10 = smov 4   ;;  %s618_s11 = smov [#allocation2]  }
   0x6   :  { %39 = dma.hbm_to_vmem [thread:$0]  %s32_s26, 1024, %s34_s28, [#allocation6], %s616_s9, %s616_s9, %s617_s10  }
   0x7   :  { %s23_s12 = sshll.u32 %s618_s11, 4  ;;  %s46_s15 = sshll.u32 %s689_s3, 4  ;;  %s24_s12 = int_to_ptr.vmem [resolvable:$true] %s23_s12  ;;  %s47_s15 = int_to_ptr.hbm [resolvable:$true] %s46_s15 }
   0x8   :  { %26 = dma.hbm_to_vmem [thread:$0]  %s22_s8, 128, %s24_s12, [#allocation3]  }
   0x9   :  { %s61_s17 = sshll.u32 %s691_s5, 4  ;;  %s619_s18 = smov [#allocation7]   ;;  %s62_s17 = int_to_ptr.hbm [resolvable:$true] %s61_s17 }
   0xa   :  { %s48_s19 = sshll.u32 %s619_s18, 4  ;;  %s620_s0 = smov [#allocation8]   ;;  %s49_s19 = int_to_ptr.vmem [resolvable:$true] %s48_s19 }
   0xb   :  { %54 = dma.hbm_to_vmem [thread:$0]  %s47_s15, 1024, %s49_s19, [#allocation6], %s616_s9, %s616_s9, %s617_s10  }
   0xc   :  { %s63_s20 = sshll.u32 %s620_s0, 4  ;;  %s64_s20 = int_to_ptr.vmem [resolvable:$true] %s63_s20 }
   0xd   :  { %69 = dma.hbm_to_vmem [thread:$0]  %s62_s17, 1024, %s64_s20, [#allocation9], %s616_s9, %s616_s9, %s617_s10  }
   0xe   :  { %607 = dma.done.wait [#allocation3], 128  }
   0xf   :  { %608 = vsyncadd [#allocation3], 4294967168 }
  0x10   :  { %609 = dma.done.wait [#allocation6], 2048  }
  0x11   :  { %610 = vsyncadd [#allocation6], 4294965248 }
  0x12   :  { %611 = dma.done.wait [#allocation9], 1024  }
  0x13   :  { %612 = vsyncadd [#allocation9], 4294966272  ;;  %v460_v0 = vld [vmem:[#allocation5 + $0x38] sm:$0xff]  ;;  %v459_v1 = vld [vmem:[#allocation5 + $0x30] sm:$0xff]  ;;  %s621_s24 = smov [#allocation10]   ;;  %s345_s28 = sshll.u32 %s693_s7, 4  ;;  %s346_s28 = int_to_ptr.hbm [resolvable:$true] %s345_s28 }
  0x14   :  { %158 = vmatpush.bf16.msra.mxu0 %v460_v0  ;;  %v468_v2 = vld [vmem:[#allocation7 + $0x38] sm:$0xff]  ;;  %v467_v3 = vld [vmem:[#allocation7 + $0x30] sm:$0xff]  ;;  %v458_v4 = vld [vmem:[#allocation5 + $0x28] sm:$0xff]  ;;  %s343_s25 = sshll.u32 %s621_s24, 4  ;;  %s344_s25 = int_to_ptr.vmem [resolvable:$true] %s343_s25 }
  0x15   :  { %241 = vmatpush.bf16.msra.mxu1 %v468_v2  ;;  %v466_v5 = vld [vmem:[#allocation7 + $0x28] sm:$0xff]  ;;  %v457_v6 = vld [vmem:[#allocation5 + $0x20] sm:$0xff]  ;;  %v456_v8 = vld [vmem:[#allocation5 + $0x18] sm:$0xff] }
  0x16   :  { %v465_v7 = vld [vmem:[#allocation7 + $0x20] sm:$0xff]  ;;  %v464_v9 = vld [vmem:[#allocation7 + $0x18] sm:$0xff]  ;;  %v455_v10 = vld [vmem:[#allocation5 + $0x10] sm:$0xff] }
  0x17   :  { %v463_v11 = vld [vmem:[#allocation7 + $0x10] sm:$0xff]  ;;  %v454_v12 = vld [vmem:[#allocation5 + $0x8] sm:$0xff]  ;;  %v453_v13 = vld [vmem:[#allocation5] sm:$0xff] }
  0x18   :  { %159 = vmatpush.bf16.msra.mxu0 %v459_v1  ;;  %v88_v14 = vld [vmem:[#allocation2] sm:$0xff]  ;;  %v462_v16 = vld [vmem:[#allocation7 + $0x8] sm:$0xff]  ;;  %v461_v17 = vld [vmem:[#allocation7] sm:$0xff] }
  0x19   :  { %242 = vmatpush.bf16.msra.mxu1 %v467_v3  ;;  %v89_v15 = vpack.c.bf16 %v88_v14, %v88_v14  ;;  %v476_v18 = vld [vmem:[#allocation8 + $0x38] sm:$0xff]  ;;  %v475_v19 = vld [vmem:[#allocation8 + $0x30] sm:$0xff]  ;;  %v474_v20 = vld [vmem:[#allocation8 + $0x28] sm:$0xff] }
  0x1a   :  { %324 = vmatpush.bf16.msra.mxu2 %v476_v18  ;;  %v473_v21 = vld [vmem:[#allocation8 + $0x20] sm:$0xff]  ;;  %v472_v22 = vld [vmem:[#allocation8 + $0x18] sm:$0xff]  ;;  %v471_v23 = vld [vmem:[#allocation8 + $0x10] sm:$0xff] }
  0x1b   :  { %v484_v24 = vld [vmem:[%s688_s2] ss:$0 sm:$0xff]  ;;  %v470_v30 = vld [vmem:[#allocation8 + $0x8] sm:$0xff]  ;;  %v469_v31 = vld [vmem:[#allocation8] sm:$0xff] }
  0x1c   :  { %160 = vmatpush.bf16.msra.mxu0 %v458_v4  ;;  %v485_v32 = vld [vmem:[%s690_s4] ss:$0 sm:$0xff] }
  0x1d   :  { %243 = vmatpush.bf16.msra.mxu1 %v466_v5  ;;  %v486_v38 = vld [vmem:[%s692_s6] ss:$0 sm:$0xff] }
  0x1e   :  { %325 = vmatpush.bf16.msra.mxu2 %v475_v19 }
  0x20   :  { %161 = vmatpush.bf16.msra.mxu0 %v457_v6 }
  0x21   :  { %244 = vmatpush.bf16.msra.mxu1 %v465_v7 }
  0x22   :  { %326 = vmatpush.bf16.msra.mxu2 %v474_v20 }
  0x24   :  { %162 = vmatpush.bf16.msra.mxu0 %v456_v8 }
  0x25   :  { %245 = vmatpush.bf16.msra.mxu1 %v464_v9 }
  0x26   :  { %327 = vmatpush.bf16.msra.mxu2 %v473_v21 }
  0x28   :  { %163 = vmatpush.bf16.msra.mxu0 %v455_v10 }
  0x29   :  { %246 = vmatpush.bf16.msra.mxu1 %v463_v11 }
  0x2a   :  { %328 = vmatpush.bf16.msra.mxu2 %v472_v22 }
  0x2c   :  { %164 = vmatpush.bf16.msra.mxu0 %v454_v12 }
  0x2d   :  { %247 = vmatpush.bf16.msra.mxu1 %v462_v16 }
  0x2e   :  { %329 = vmatpush.bf16.msra.mxu2 %v471_v23 }
  0x30   :  { %165 = vmatpush.bf16.msra.mxu0 %v453_v13 }
  0x31   :  { %248 = vmatpush.bf16.msra.mxu1 %v461_v17 }
  0x32   :  { %330 = vmatpush.bf16.msra.mxu2 %v470_v30 }
  0x33   :  { %166 = vmatmul.bf16.vlgmr.msra.gmra.mxu0 %v89_v15 }
  0x36   :  { %331 = vmatpush.bf16.msra.mxu2 %v469_v31 }
  0xb0   :  { %v167_v25 = vpop.f32.mrf.mxu0 }
  0xb1   :  { %v168_v26 = vadd.f32 %v484_v24, %v167_v25 }
  0xb3   :  { %v171_v27 = vmax.f32 %v168_v26, 0.0 }
  0xb5   :  { %v172_v28 = vpack.c.bf16 %v171_v27, %v171_v27 }
  0xb7   :  { %249 = vmatmul.bf16.vlgmr.msra.gmra.mxu1 %v172_v28 }
  0xb8   :  { %v169_v29 = vpop.f32.mrf.mxu0 }
 0x134   :  { %v250_v33 = vpop.f32.mrf.mxu1 }
 0x135   :  { %v251_v34 = vadd.f32 %v485_v32, %v250_v33 }
 0x137   :  { %v254_v35 = vmax.f32 %v251_v34, 0.0 }
 0x139   :  { %v255_v36 = vpack.c.bf16 %v254_v35, %v254_v35 }
 0x13b   :  { %332 = vmatmul.bf16.vlgmr.msra.gmra.mxu2 %v255_v36 }
 0x13c   :  { %v252_v37 = vpop.f32.mrf.mxu1 }
 0x1be   :  { %v333_v39 = vpop.f32.mrf.mxu2 }
 0x1bf   :  { %v334_v40 = vadd.f32 %v486_v38, %v333_v39 }
 0x1c1   :  { %337 = vst [vmem:[#allocation10] sm:$0xff] %v334_v40 }
 0x1c2   :  { %348 = dma.vmem_to_hbm [thread:$0]  %s344_s25, 128, %s346_s28, [#allocation4]  }
 0x1c6   :  { %v335_v41 = vpop.f32.mrf.mxu2 }
 0x1c7   :  { %613 = dma.done.wait [#allocation4], 128  }
 0x1c8   :  { %614 = vsyncadd [#allocation4], 4294967168 }
 0x1c9   :  { %353 = vsyncpa [#allocation3], 1 }
 0x1ca   :  { %354 = vsyncpa [#allocation6], 1 }
 0x1cb   :  { %355 = vsyncpa [#allocation9], 1 }
 0x1cc   :  { %356 = vsyncpa [#allocation4], 1 }

// kernel: tpu_custom_call.1
= control target key start
LH: loop header
LB: loop body
LE: loop exit
PB: predicated region body
PF: predicated region fallthrough
CT: control target
= control target key end

     0   :  { %12 = vsyncpa [#allocation3], 0  ;;  %s686_s0 = inlined_call_operand.hbm [shape: f32[8,128], index: 0, kind: input, shape index: {}]   ;;  %s687_s1 = inlined_call_operand.hbm [shape: bf16[128,128], index: 1, kind: input, shape index: {}]   ;;  %s688_s2 = inlined_call_operand.vmem [shape: f32[1,128], index: 2, kind: input, shape index: {}]   ;;  %s689_s3 = inlined_call_operand.hbm [shape: bf16[128,128], index: 3, kind: input, shape index: {}]   ;;  %s690_s4 = inlined_call_operand.vmem [shape: f32[1,128], index: 4, kind: input, shape index: {}]   ;;  %s691_s5 = inlined_call_operand.hbm [shape: bf16[128,128], index: 5, kind: input, shape index: {}]   ;;  %s692_s6 = inlined_call_operand.vmem [shape: f32[1,128], index: 6, kind: input, shape index: {}]   ;;  %s693_s7 = inlined_call_operand.hbm [shape: f32[8,128], index: 7, kind: output, shape index: {}]  }
   0x1   :  { %13 = vsyncpa [#allocation6], 0 }
   0x2   :  { %14 = vsyncpa [#allocation9], 0  ;;  %s31_s26 = sshll.u32 %s687_s1, 4  ;;  %s32_s26 = int_to_ptr.hbm [resolvable:$true] %s31_s26 }
   0x3   :  { %15 = vsyncpa [#allocation4], 0  ;;  %s615_s27 = smov [#allocation5]   ;;  %s21_s8 = sshll.u32 %s686_s0, 4  ;;  %s22_s8 = int_to_ptr.hbm [resolvable:$true] %s21_s8 }
   0x4   :  { %s33_s28 = sshll.u32 %s615_s27, 4  ;;  %s616_s9 = smov 64   ;;  %s34_s28 = int_to_ptr.vmem [resolvable:$true] %s33_s28 }
   0x5   :  { %s617_s10 = smov 4   ;;  %s618_s11 = smov [#allocation2]  }
   0x6   :  { %39 = dma.hbm_to_vmem [thread:$0]  %s32_s26, 1024, %s34_s28, [#allocation6], %s616_s9, %s616_s9, %s617_s10  }
   0x7   :  { %s23_s12 = sshll.u32 %s618_s11, 4  ;;  %s46_s15 = sshll.u32 %s689_s3, 4  ;;  %s24_s12 = int_to_ptr.vmem [resolvable:$true] %s23_s12  ;;  %s47_s15 = int_to_ptr.hbm [resolvable:$true] %s46_s15 }
   0x8   :  { %26 = dma.hbm_to_vmem [thread:$0]  %s22_s8, 128, %s24_s12, [#allocation3]  }
   0x9   :  { %s61_s17 = sshll.u32 %s691_s5, 4  ;;  %s619_s18 = smov [#allocation7]   ;;  %s62_s17 = int_to_ptr.hbm [resolvable:$true] %s61_s17 }
   0xa   :  { %s48_s19 = sshll.u32 %s619_s18, 4  ;;  %s620_s0 = smov [#allocation8]   ;;  %s49_s19 = int_to_ptr.vmem [resolvable:$true] %s48_s19 }
   0xb   :  { %54 = dma.hbm_to_vmem [thread:$0]  %s47_s15, 1024, %s49_s19, [#allocation6], %s616_s9, %s616_s9, %s617_s10  }
   0xc   :  { %s63_s20 = sshll.u32 %s620_s0, 4  ;;  %s64_s20 = int_to_ptr.vmem [resolvable:$true] %s63_s20 }
   0xd   :  { %69 = dma.hbm_to_vmem [thread:$0]  %s62_s17, 1024, %s64_s20, [#allocation9], %s616_s9, %s616_s9, %s617_s10  }
   0xe   :  { %607 = dma.done.wait [#allocation3], 128  }
   0xf   :  { %608 = vsyncadd [#allocation3], 4294967168 }
  0x10   :  { %609 = dma.done.wait [#allocation6], 2048  }
  0x11   :  { %610 = vsyncadd [#allocation6], 4294965248 }
  0x12   :  { %611 = dma.done.wait [#allocation9], 1024  }
  0x13   :  { %612 = vsyncadd [#allocation9], 4294966272  ;;  %v460_v0 = vld [vmem:[#allocation5 + $0x38] sm:$0xff]  ;;  %v459_v1 = vld [vmem:[#allocation5 + $0x30] sm:$0xff]  ;;  %s621_s24 = smov [#allocation10]   ;;  %s345_s28 = sshll.u32 %s693_s7, 4  ;;  %s346_s28 = int_to_ptr.hbm [resolvable:$true] %s345_s28 }
  0x14   :  { %158 = vmatpush.bf16.msra.mxu0 %v460_v0  ;;  %v468_v2 = vld [vmem:[#allocation7 + $0x38] sm:$0xff]  ;;  %v467_v3 = vld [vmem:[#allocation7 + $0x30] sm:$0xff]  ;;  %v458_v4 = vld [vmem:[#allocation5 + $0x28] sm:$0xff]  ;;  %s343_s25 = sshll.u32 %s621_s24, 4  ;;  %s344_s25 = int_to_ptr.vmem [resolvable:$true] %s343_s25 }
  0x15   :  { %241 = vmatpush.bf16.msra.mxu1 %v468_v2  ;;  %v466_v5 = vld [vmem:[#allocation7 + $0x28] sm:$0xff]  ;;  %v457_v6 = vld [vmem:[#allocation5 + $0x20] sm:$0xff]  ;;  %v456_v8 = vld [vmem:[#allocation5 + $0x18] sm:$0xff] }
  0x16   :  { %v465_v7 = vld [vmem:[#allocation7 + $0x20] sm:$0xff]  ;;  %v464_v9 = vld [vmem:[#allocation7 + $0x18] sm:$0xff]  ;;  %v455_v10 = vld [vmem:[#allocation5 + $0x10] sm:$0xff] }
  0x17   :  { %v463_v11 = vld [vmem:[#allocation7 + $0x10] sm:$0xff]  ;;  %v454_v12 = vld [vmem:[#allocation5 + $0x8] sm:$0xff]  ;;  %v453_v13 = vld [vmem:[#allocation5] sm:$0xff] }
  0x18   :  { %159 = vmatpush.bf16.msra.mxu0 %v459_v1  ;;  %v88_v14 = vld [vmem:[#allocation2] sm:$0xff]  ;;  %v462_v16 = vld [vmem:[#allocation7 + $0x8] sm:$0xff]  ;;  %v461_v17 = vld [vmem:[#allocation7] sm:$0xff] }
  0x19   :  { %242 = vmatpush.bf16.msra.mxu1 %v467_v3  ;;  %v89_v15 = vpack.c.bf16 %v88_v14, %v88_v14  ;;  %v476_v18 = vld [vmem:[#allocation8 + $0x38] sm:$0xff]  ;;  %v475_v19 = vld [vmem:[#allocation8 + $0x30] sm:$0xff]  ;;  %v474_v20 = vld [vmem:[#allocation8 + $0x28] sm:$0xff] }
  0x1a   :  { %324 = vmatpush.bf16.msra.mxu2 %v476_v18  ;;  %v473_v21 = vld [vmem:[#allocation8 + $0x20] sm:$0xff]  ;;  %v472_v22 = vld [vmem:[#allocation8 + $0x18] sm:$0xff]  ;;  %v471_v23 = vld [vmem:[#allocation8 + $0x10] sm:$0xff] }
  0x1b   :  { %v484_v24 = vld [vmem:[%s688_s2] ss:$0 sm:$0xff]  ;;  %v470_v30 = vld [vmem:[#allocation8 + $0x8] sm:$0xff]  ;;  %v469_v31 = vld [vmem:[#allocation8] sm:$0xff] }
  0x1c   :  { %160 = vmatpush.bf16.msra.mxu0 %v458_v4  ;;  %v485_v32 = vld [vmem:[%s690_s4] ss:$0 sm:$0xff] }
  0x1d   :  { %243 = vmatpush.bf16.msra.mxu1 %v466_v5  ;;  %v486_v38 = vld [vmem:[%s692_s6] ss:$0 sm:$0xff] }
  0x1e   :  { %325 = vmatpush.bf16.msra.mxu2 %v475_v19 }
  0x20   :  { %161 = vmatpush.bf16.msra.mxu0 %v457_v6 }
  0x21   :  { %244 = vmatpush.bf16.msra.mxu1 %v465_v7 }
  0x22   :  { %326 = vmatpush.bf16.msra.mxu2 %v474_v20 }
  0x24   :  { %162 = vmatpush.bf16.msra.mxu0 %v456_v8 }
  0x25   :  { %245 = vmatpush.bf16.msra.mxu1 %v464_v9 }
  0x26   :  { %327 = vmatpush.bf16.msra.mxu2 %v473_v21 }
  0x28   :  { %163 = vmatpush.bf16.msra.mxu0 %v455_v10 }
  0x29   :  { %246 = vmatpush.bf16.msra.mxu1 %v463_v11 }
  0x2a   :  { %328 = vmatpush.bf16.msra.mxu2 %v472_v22 }
  0x2c   :  { %164 = vmatpush.bf16.msra.mxu0 %v454_v12 }
  0x2d   :  { %247 = vmatpush.bf16.msra.mxu1 %v462_v16 }
  0x2e   :  { %329 = vmatpush.bf16.msra.mxu2 %v471_v23 }
  0x30   :  { %165 = vmatpush.bf16.msra.mxu0 %v453_v13 }
  0x31   :  { %248 = vmatpush.bf16.msra.mxu1 %v461_v17 }
  0x32   :  { %330 = vmatpush.bf16.msra.mxu2 %v470_v30 }
  0x33   :  { %166 = vmatmul.bf16.vlgmr.msra.gmra.mxu0 %v89_v15 }
  0x36   :  { %331 = vmatpush.bf16.msra.mxu2 %v469_v31 }
  0xb0   :  { %v167_v25 = vpop.f32.mrf.mxu0 }
  0xb1   :  { %v168_v26 = vadd.f32 %v484_v24, %v167_v25 }
  0xb3   :  { %v171_v27 = vmax.f32 %v168_v26, 0.0 }
  0xb5   :  { %v172_v28 = vpack.c.bf16 %v171_v27, %v171_v27 }
  0xb7   :  { %249 = vmatmul.bf16.vlgmr.msra.gmra.mxu1 %v172_v28 }
  0xb8   :  { %v169_v29 = vpop.f32.mrf.mxu0 }
 0x134   :  { %v250_v33 = vpop.f32.mrf.mxu1 }
 0x135   :  { %v251_v34 = vadd.f32 %v485_v32, %v250_v33 }
 0x137   :  { %v254_v35 = vmax.f32 %v251_v34, 0.0 }
 0x139   :  { %v255_v36 = vpack.c.bf16 %v254_v35, %v254_v35 }
 0x13b   :  { %332 = vmatmul.bf16.vlgmr.msra.gmra.mxu2 %v255_v36 }
 0x13c   :  { %v252_v37 = vpop.f32.mrf.mxu1 }
 0x1be   :  { %v333_v39 = vpop.f32.mrf.mxu2 }
 0x1bf   :  { %v334_v40 = vadd.f32 %v486_v38, %v333_v39 }
 0x1c1   :  { %337 = vst [vmem:[#allocation10] sm:$0xff] %v334_v40 }
 0x1c2   :  { %348 = dma.vmem_to_hbm [thread:$0]  %s344_s25, 128, %s346_s28, [#allocation4]  }
 0x1c6   :  { %v335_v41 = vpop.f32.mrf.mxu2 }
 0x1c7   :  { %613 = dma.done.wait [#allocation4], 128  }
 0x1c8   :  { %614 = vsyncadd [#allocation4], 4294967168 }
 0x1c9   :  { %353 = vsyncpa [#allocation3], 1 }
 0x1ca   :  { %354 = vsyncpa [#allocation6], 1 }
 0x1cb   :  { %355 = vsyncpa [#allocation9], 1 }
 0x1cc   :  { %356 = vsyncpa [#allocation4], 1 }

</bundles_post_ra>
